<compile_context>
chip_gen: v6e
topology: v6e:2x2x1
jax: 0.10.0
libtpu: 0.0.40
codegen_flags: <defaults>
</compile_context>

<pallas_src>
import math

import jax
import jax.numpy as jnp
from jax.experimental import pallas as pl
from jax.experimental.pallas import tpu as pltpu


# Temporal vocab layout (freq='h'):
#   hour[0:24) | weekday[24:31) | day[31:63) | month[63:76)
_OFF_HOUR, _OFF_WDAY, _OFF_DAY, _OFF_MONTH = 0, 24, 31, 63
_V_TOTAL = 76


def _round_up(x, m):
    return ((x + m - 1) // m) * m


def _pick_seqs_per_tile(B, L, row_target):
    """Whole sequences per row tile (tile rows = nb * L).

    nb must divide B and nb*L must be a multiple of 8 (sublane rule) unless
    the tile covers the full array.  Returns the largest tile <= row_target,
    else the smallest legal tile (always exists: nb = B is full-extent)."""
    best, smallest = None, None
    for nb in range(1, B + 1):
        if B % nb:
            continue
        tm = nb * L
        if tm % 8 != 0 and tm != B * L:
            continue
        if smallest is None:
            smallest = nb
        if tm <= row_target:
            best = nb
    # TODO(synk): pad B*L in the wrapper for pathological shapes where only the
    # full-extent tile is legal (keeps pipelining / bounded VMEM on v7x).
    return best if best is not None else smallest


# --------------------------------- wrapper -----------------------------------

def data_embedding_wo_pos(x, x_mark, w_conv, temporal_table, *,
                          row_target=1024,
                          compute_dtype=jnp.bfloat16,
                          out_dtype=jnp.bfloat16):
    """x: [B,L,c_in] f32, x_mark: [B,L,>=4] int ([month, day, weekday, hour, ...]),
    w_conv: [d_model, c_in, 3] f32, temporal_table: [76, d_model] f32.
    Returns [B, L, d_model] in `out_dtype` (bf16 by default; f32 accumulation)."""
    B, L, c_in = x.shape
    d_model = w_conv.shape[0]
    V = temporal_table.shape[0]
    assert V == _V_TOTAL
    c3 = 3 * c_in
    BL = B * L
    kp = _round_up(c3 + V, 128)          # fused K axis: [conv window | temporal vocab]

    # Fused resident weight: rows [0,c3) = flattened conv weight, [c3,c3+V) = table.
    #   W_flat[k*c_in + c, d] = w_conv[d, c, k]
    # Tiny, VMEM-resident, bf16 on the MXU (f32 accumulation).
    # TODO(synk): keep the fused weight f32 + HIGHEST-precision dot if bit-closer
    # fidelity to the f32 PyTorch module is required (it is VMEM-resident anyway).
    w_flat = jnp.transpose(w_conv, (2, 1, 0)).reshape(c3, d_model)
    w_fused = jnp.zeros((kp, d_model), jnp.float32)
    w_fused = w_fused.at[:c3].set(w_flat)
    w_fused = w_fused.at[c3:c3 + V].set(temporal_table)
    w_fused = w_fused.astype(compute_dtype)

    nb = _pick_seqs_per_tile(B, L, row_target)   # whole sequences per tile
    tm = nb * L                                  # rows per grid step
    grid = (BL // tm,)

    # Free reshapes only -- no casts / rolls / concats materialized in HBM.
    x2 = x.reshape(BL, c_in)
    m2 = x_mark[..., 0:4].reshape(BL, 4).astype(jnp.int32)

    def kernel(x_ref, mark_ref, w_ref, o_ref, lhs_ref):
        # ---- multi-hot temporal indicator over fused lanes [c3, c3+V) ----
        # Raw indices are offset in-kernel.  Out-of-range indices miss every
        # lane and contribute a zero embedding (nn.Embedding would raise);
        # clamp upstream if x_mark can be dirty.
        lane = jax.lax.broadcasted_iota(jnp.int32, (tm, kp), 1)
        m = mark_ref[...]                                   # (tm, 4) int32
        hit = ((lane == m[:, 3:4] + (c3 + _OFF_HOUR)) |
               (lane == m[:, 2:3] + (c3 + _OFF_WDAY)) |
               (lane == m[:, 1:2] + (c3 + _OFF_DAY)) |
               (lane == m[:, 0:1] + (c3 + _OFF_MONTH)))
        # (also zeroes lanes [0, c3) and the K padding tail)
        lhs_ref[...] = jnp.where(hit, 1.0, 0.0).astype(lhs_ref.dtype)

        # ---- circular 3-tap conv window built on-chip (lanes [0, 3*c_in)) ----
        xw = x_ref[...]                                     # (tm, c_in) f32
        prev = pltpu.roll(xw, 1 % tm, axis=0)               # row t <- x[t-1]
        nxt = pltpu.roll(xw, (tm - 1) % tm, axis=0)         # row t <- x[t+1]
        # Per-sequence circular wrap (tile = nb whole sequences of length L).
        row = jax.lax.broadcasted_iota(jnp.int32, (tm, c_in), 0) % L
        prev = jnp.where(row == 0, pltpu.roll(xw, (1 - L) % tm, axis=0), prev)
        nxt = jnp.where(row == L - 1, pltpu.roll(xw, (L - 1) % tm, axis=0), nxt)
        window = jnp.concatenate([prev, xw, nxt], axis=-1)  # (tm, 3*c_in)
        lhs_ref[:, 0:c3] = window.astype(lhs_ref.dtype)

        # ---- one fused MXU push, f32 accumulation, out_dtype store ----
        o_ref[...] = jnp.dot(lhs_ref[...], w_ref[...],
                             preferred_element_type=jnp.float32).astype(o_ref.dtype)

    out = pl.pallas_call(
        kernel,
        out_shape=jax.ShapeDtypeStruct((BL, d_model), out_dtype),
        grid_spec=pltpu.PrefetchScalarGridSpec(
            num_scalar_prefetch=0,
            grid=grid,
            in_specs=[
                pl.BlockSpec((tm, c_in), lambda i: (i, 0)),     # x rows (f32)
                pl.BlockSpec((tm, 4), lambda i: (i, 0)),        # packed marks (i32)
                pl.BlockSpec((kp, d_model), lambda i: (0, 0)),  # resident fused weight
            ],
            out_specs=pl.BlockSpec((tm, d_model), lambda i: (i, 0)),
            scratch_shapes=[pltpu.VMEM((tm, kp), compute_dtype)],
        ),
        compiler_params=pltpu.CompilerParams(
            dimension_semantics=("parallel",)),
    )(x2, m2, w_fused)

    return out.reshape(B, L, d_model)


# --------------------------- parameter construction -------------------------

def fixed_embedding_table(c_in, d_model):
    """Sinusoidal table identical to FixedEmbedding.__init__."""
    position = jnp.arange(c_in, dtype=jnp.float32)[:, None]
    div_term = jnp.exp(jnp.arange(0, d_model, 2, dtype=jnp.float32)
                       * -(math.log(10000.0) / d_model))
    w = jnp.zeros((c_in, d_model), dtype=jnp.float32)
    w = w.at[:, 0::2].set(jnp.sin(position * div_term))
    w = w.at[:, 1::2].set(jnp.cos(position * div_term))
    return w


def make_params(key, c_in, d_model):
    # Conv1d weight [d_model, c_in, 3], kaiming_normal fan_in, leaky_relu gain.
    fan_in = c_in * 3
    gain = math.sqrt(2.0 / (1.0 + 0.01 ** 2))
    std = gain / math.sqrt(fan_in)
    w_conv = std * jax.random.normal(key, (d_model, c_in, 3), dtype=jnp.float32)

    # Concatenated fixed tables: hour(24) | weekday(7) | day(32) | month(13)
    table = jnp.concatenate([
        fixed_embedding_table(24, d_model),
        fixed_embedding_table(7, d_model),
        fixed_embedding_table(32, d_model),
        fixed_embedding_table(13, d_model),
    ], axis=0)  # [76, d_model]
    return w_conv, table


# --------------------------------- references --------------------------------

def reference_f32(x, x_mark, w_conv, table):
    """Pure-f32 module math: circular-conv token embedding + fixed temporal
    embedding lookups (dropout is identity in eval)."""
    c_in = x.shape[-1]
    d_model = w_conv.shape[0]
    x_unf = jnp.concatenate([jnp.roll(x, 1 - k, axis=1) for k in range(3)], -1)
    w_flat = jnp.transpose(w_conv, (2, 1, 0)).reshape(3 * c_in, d_model)
    conv = x_unf @ w_flat
    temp = (table[x_mark[..., 3] + _OFF_HOUR] + table[x_mark[..., 2] + _OFF_WDAY]
            + table[x_mark[..., 1] + _OFF_DAY] + table[x_mark[..., 0] + _OFF_MONTH])
    return conv + temp


def reference_matched(x, x_mark, w_conv, table, compute_dtype, out_dtype):
    """Same math with operands cast to the kernel's compute dtype, f32
    accumulation, and the kernel's output dtype."""
    c_in = x.shape[-1]
    x_unf = jnp.concatenate([jnp.roll(x, 1 - k, axis=1) for k in range(3)], -1)
    w_flat = jnp.transpose(w_conv, (2, 1, 0)).reshape(3 * c_in, w_conv.shape[0])
    conv = jnp.dot(x_unf.astype(compute_dtype), w_flat.astype(compute_dtype),
                   preferred_element_type=jnp.float32)
    t = table.astype(compute_dtype).astype(jnp.float32)
    temp = (t[x_mark[..., 3] + _OFF_HOUR] + t[x_mark[..., 2] + _OFF_WDAY]
            + t[x_mark[..., 1] + _OFF_DAY] + t[x_mark[..., 0] + _OFF_MONTH])
    return (conv + temp).astype(out_dtype)


# ------------------------------------ main -----------------------------------

if __name__ == "__main__":
    B, L, c_in, d_model = 2, 8, 4, 32

    key = jax.random.PRNGKey(0)
    k_x, k_w, k_m1, k_m2, k_m3, k_m4 = jax.random.split(key, 6)

    x = jax.random.normal(k_x, (B, L, c_in), dtype=jnp.float32)
    x_mark = jnp.stack([
        jax.random.randint(k_m1, (B, L), 0, 13),   # month
        jax.random.randint(k_m2, (B, L), 0, 32),   # day
        jax.random.randint(k_m3, (B, L), 0, 7),    # weekday
        jax.random.randint(k_m4, (B, L), 0, 24),   # hour
    ], axis=-1).astype(jnp.int32)                  # [B, L, 4]

    w_conv, table = make_params(k_w, c_in, d_model)

    out = data_embedding_wo_pos(x, x_mark, w_conv, table)
    out = jax.block_until_ready(out)
    assert out.shape == (B, L, d_model)

    # Tight check vs. a reference with matched bf16 operands / f32 accumulation
    # / bf16 output (only f32 summation-order + 1-ulp output rounding differ).
    ref_m = reference_matched(x, x_mark, w_conv, table, jnp.bfloat16, jnp.bfloat16)
    assert jnp.allclose(out.astype(jnp.float32), ref_m.astype(jnp.float32),
                        atol=5e-2, rtol=5e-2), "mismatch vs matched ref"

    # Loose check vs. the pure-f32 module math (difference is only the ~2^-8
    # relative bf16 quantization of operands and of the stored output).
    ref = reference_f32(x, x_mark, w_conv, table)
    assert jnp.allclose(out.astype(jnp.float32), ref,
                        atol=1e-1, rtol=1e-1), "mismatch vs f32 reference"

    print("KERNEL_OK")
</pallas_src>

<mosaic_0001>
module attributes {stable_mosaic.version = 11 : i64} {
  func.func @kernel(%arg0: i32, %arg1: memref<16x4xf32, #tpu.memory_space<vmem>>, %arg2: memref<16x4xi32, #tpu.memory_space<vmem>>, %arg3: memref<128x32xbf16, #tpu.memory_space<vmem>>, %arg4: memref<16x32xbf16, #tpu.memory_space<vmem>>, %arg5: memref<16x128xbf16, #tpu.memory_space<vmem>>) attributes {dimension_semantics = [#tpu.dimension_semantics<parallel>], iteration_bounds = array<i64: 1>, scalar_prefetch = 0 : i64, scratch_operands = 1 : i64, tpu.core_type = #tpu.core_type<tc>, window_params = [{transform_indices = @transform_0, window_bounds = array<i64: 16, 4>}, {transform_indices = @transform_1, window_bounds = array<i64: 16, 4>}, {pipeline_mode = #tpu.pipeline_mode<synchronous>, transform_indices = @transform_2, window_bounds = array<i64: 128, 32>}, {transform_indices = @transform_3, window_bounds = array<i64: 16, 32>}]} {
    %0 = tpu.iota {dimensions = array<i32: 1>} : vector<16x128xi32>
    %c0 = arith.constant 0 : index
    %c0_0 = arith.constant 0 : index
    %1 = vector.load %arg2[%c0, %c0_0] : memref<16x4xi32, #tpu.memory_space<vmem>>, vector<16x4xi32>
    %2 = vector.extract_strided_slice %1 {offsets = [0, 3], sizes = [16, 1], strides = [1, 1]} : vector<16x4xi32> to vector<16x1xi32>
    %c12_i32 = arith.constant 12 : i32
    %3 = vector.broadcast %c12_i32 : i32 to vector<16x1xi32>
    %4 = arith.addi %2, %3 : vector<16x1xi32>
    %5 = vector.broadcast %4 : vector<16x1xi32> to vector<16x128xi32>
    %6 = arith.cmpi eq, %0, %5 : vector<16x128xi32>
    %7 = vector.extract_strided_slice %1 {offsets = [0, 2], sizes = [16, 1], strides = [1, 1]} : vector<16x4xi32> to vector<16x1xi32>
    %c36_i32 = arith.constant 36 : i32
    %8 = vector.broadcast %c36_i32 : i32 to vector<16x1xi32>
    %9 = arith.addi %7, %8 : vector<16x1xi32>
    %10 = vector.broadcast %9 : vector<16x1xi32> to vector<16x128xi32>
    %11 = arith.cmpi eq, %0, %10 : vector<16x128xi32>
    %12 = arith.ori %6, %11 : vector<16x128xi1>
    %13 = vector.extract_strided_slice %1 {offsets = [0, 1], sizes = [16, 1], strides = [1, 1]} : vector<16x4xi32> to vector<16x1xi32>
    %c43_i32 = arith.constant 43 : i32
    %14 = vector.broadcast %c43_i32 : i32 to vector<16x1xi32>
    %15 = arith.addi %13, %14 : vector<16x1xi32>
    %16 = vector.broadcast %15 : vector<16x1xi32> to vector<16x128xi32>
    %17 = arith.cmpi eq, %0, %16 : vector<16x128xi32>
    %18 = arith.ori %12, %17 : vector<16x128xi1>
    %19 = vector.extract_strided_slice %1 {offsets = [0, 0], sizes = [16, 1], strides = [1, 1]} : vector<16x4xi32> to vector<16x1xi32>
    %c75_i32 = arith.constant 75 : i32
    %20 = vector.broadcast %c75_i32 : i32 to vector<16x1xi32>
    %21 = arith.addi %19, %20 : vector<16x1xi32>
    %22 = vector.broadcast %21 : vector<16x1xi32> to vector<16x128xi32>
    %23 = arith.cmpi eq, %0, %22 : vector<16x128xi32>
    %24 = arith.ori %18, %23 : vector<16x128xi1>
    %cst = arith.constant 1.000000e+00 : f32
    %cst_1 = arith.constant 0.000000e+00 : f32
    %25 = vector.broadcast %cst : f32 to vector<16x128xf32>
    %26 = vector.broadcast %cst_1 : f32 to vector<16x128xf32>
    %27 = arith.select %24, %25, %26 : vector<16x128xi1>, vector<16x128xf32>
    %28 = arith.truncf %27 : vector<16x128xf32> to vector<16x128xbf16>
    %c0_2 = arith.constant 0 : index
    %c0_3 = arith.constant 0 : index
    %29 = vector.load %arg5[%c0_2, %c0_3] : memref<16x128xbf16, #tpu.memory_space<vmem>>, vector<16x128xbf16>
    tpu.vector_store %arg5[%c0_2, %c0_3], %28 {strides = array<i32>} : memref<16x128xbf16, #tpu.memory_space<vmem>>, vector<16x128xbf16>,
    %c0_4 = arith.constant 0 : index
    %c0_5 = arith.constant 0 : index
    %30 = vector.load %arg1[%c0_4, %c0_5] : memref<16x4xf32, #tpu.memory_space<vmem>>, vector<16x4xf32>
    %c1_i32 = arith.constant 1 : i32
    %31 = tpu.dynamic_rotate %30 by %c1_i32 dim 0 : vector<16x4xf32>, i32 -> vector<16x4xf32>
    %c15_i32 = arith.constant 15 : i32
    %32 = tpu.dynamic_rotate %30 by %c15_i32 dim 0 : vector<16x4xf32>, i32 -> vector<16x4xf32>
    %33 = tpu.iota {dimensions = array<i32: 0>} : vector<16x4xi32>
    %c8_i32 = arith.constant 8 : i32
    %c0_i32 = arith.constant 0 : i32
    %34 = arith.cmpi eq, %c8_i32, %c0_i32 : i32
    %c1_i32_6 = arith.constant 1 : i32
    %35 = arith.select %34, %c1_i32_6, %c8_i32 : i32
    %36 = vector.broadcast %35 : i32 to vector<16x4xi32>
    %37 = arith.remsi %33, %36 : vector<16x4xi32>
    %c0_i32_7 = arith.constant 0 : i32
    %38 = vector.broadcast %c0_i32_7 : i32 to vector<16x4xi32>
    %39 = arith.cmpi ne, %37, %38 : vector<16x4xi32>
    %c0_i32_8 = arith.constant 0 : i32
    %40 = vector.broadcast %c0_i32_8 : i32 to vector<16x4xi32>
    %41 = arith.cmpi slt, %37, %40 : vector<16x4xi32>
    %c0_i32_9 = arith.constant 0 : i32
    %42 = arith.cmpi slt, %35, %c0_i32_9 : i32
    %43 = vector.broadcast %42 : i1 to vector<16x4xi1>
    %44 = vector.broadcast %43 : vector<16x4xi1> to vector<16x4xi1>
    %45 = arith.xori %41, %44 : vector<16x4xi1>
    %46 = arith.andi %45, %39 : vector<16x4xi1>
    %47 = vector.broadcast %35 : i32 to vector<16x4xi32>
    %48 = arith.addi %37, %47 : vector<16x4xi32>
    %49 = arith.select %46, %48, %37 : vector<16x4xi1>, vector<16x4xi32>
    %c0_i32_10 = arith.constant 0 : i32
    %50 = vector.broadcast %c0_i32_10 : i32 to vector<16x4xi32>
    %51 = arith.cmpi eq, %49, %50 : vector<16x4xi32>
    %c9_i32 = arith.constant 9 : i32
    %52 = tpu.dynamic_rotate %30 by %c9_i32 dim 0 : vector<16x4xf32>, i32 -> vector<16x4xf32>
    %53 = arith.select %51, %52, %31 : vector<16x4xi1>, vector<16x4xf32>
    %c7_i32 = arith.constant 7 : i32
    %54 = vector.broadcast %c7_i32 : i32 to vector<16x4xi32>
    %55 = arith.cmpi eq, %49, %54 : vector<16x4xi32>
    %c7_i32_11 = arith.constant 7 : i32
    %56 = tpu.dynamic_rotate %30 by %c7_i32_11 dim 0 : vector<16x4xf32>, i32 -> vector<16x4xf32>
    %57 = arith.select %55, %56, %32 : vector<16x4xi1>, vector<16x4xf32>
    %58 = tpu.concatenate %53, %30, %57 in 1 : vector<16x4xf32>, vector<16x4xf32>, vector<16x4xf32> -> vector<16x12xf32>
    %59 = arith.truncf %58 : vector<16x12xf32> to vector<16x12xbf16>
    %c0_12 = arith.constant 0 : index
    %c0_13 = arith.constant 0 : index
    %60 = vector.load %arg5[%c0_12, %c0_13] : memref<16x128xbf16, #tpu.memory_space<vmem>>, vector<16x12xbf16>
    tpu.vector_store %arg5[%c0_12, %c0_13], %59 {strides = array<i32>} : memref<16x128xbf16, #tpu.memory_space<vmem>>, vector<16x12xbf16>,
    %c0_14 = arith.constant 0 : index
    %c0_15 = arith.constant 0 : index
    %61 = vector.load %arg5[%c0_14, %c0_15] : memref<16x128xbf16, #tpu.memory_space<vmem>>, vector<16x128xbf16>
    %c0_16 = arith.constant 0 : index
    %c0_17 = arith.constant 0 : index
    %62 = vector.load %arg3[%c0_16, %c0_17] : memref<128x32xbf16, #tpu.memory_space<vmem>>, vector<128x32xbf16>
    %cst_18 = arith.constant dense<0.000000e+00> : vector<16x32xf32>
    %63 = tpu.matmul %61, %62, %cst_18 {dimension_numbers = #tpu.dot_dimension_numbers<[1], [0], [0], [1], [0, 0, 1, 1], [], []>} : vector<16x128xbf16>, vector<128x32xbf16>, vector<16x32xf32> -> vector<16x32xf32>
    %64 = arith.truncf %63 : vector<16x32xf32> to vector<16x32xbf16>
    %c0_19 = arith.constant 0 : index
    %c0_20 = arith.constant 0 : index
    %65 = vector.load %arg4[%c0_19, %c0_20] : memref<16x32xbf16, #tpu.memory_space<vmem>>, vector<16x32xbf16>
    tpu.vector_store %arg4[%c0_19, %c0_20], %64 {strides = array<i32>} : memref<16x32xbf16, #tpu.memory_space<vmem>>, vector<16x32xbf16>,
    return
  }
  func.func @transform_0(%arg0: i32) -> (i32, i32) {
    %c0_i32 = arith.constant 0 : i32
    %c0_i32_0 = arith.constant 0 : i32
    return %arg0, %c0_i32 : i32, i32
  }
  func.func @transform_1(%arg0: i32) -> (i32, i32) {
    %c0_i32 = arith.constant 0 : i32
    %c0_i32_0 = arith.constant 0 : i32
    return %arg0, %c0_i32 : i32, i32
  }
  func.func @transform_2(%arg0: i32) -> (i32, i32) {
    %c0_i32 = arith.constant 0 : i32
    %c0_i32_0 = arith.constant 0 : i32
    %c0_i32_1 = arith.constant 0 : i32
    return %c0_i32, %c0_i32_0 : i32, i32
  }
  func.func @transform_3(%arg0: i32) -> (i32, i32) {
    %c0_i32 = arith.constant 0 : i32
    %c0_i32_0 = arith.constant 0 : i32
    return %arg0, %c0_i32 : i32, i32
  }
}

</mosaic_0001>

<bundles_post_ra>
// kernel: tpu_custom_call.1
= control target key start
LH: loop header
LB: loop body
LE: loop exit
PB: predicated region body
PF: predicated region fallthrough
CT: control target
= control target key end

     0   :  { %v408_v2 = vmov 2   ;;  %v409_v3 = vmov 3   ;;  %v16_v11 = vlaneseq  ;;  %v410_v12 = vmov 0.0   ;;  %s524_s0 = inlined_call_operand.vmem [shape: f32[16,4], index: 0, kind: input, shape index: {}]   ;;  %s525_s1 = inlined_call_operand.vmem [shape: s32[16,4], index: 1, kind: input, shape index: {}]   ;;  %s526_s2 = inlined_call_operand.vmem [shape: bf16[128,32], index: 2, kind: input, shape index: {}]   ;;  %s527_s3 = inlined_call_operand.hbm [shape: bf16[16,32], index: 3, kind: output, shape index: {}]  }
   0x1   :  { %v18_v0 = vld [vmem:[%s525_s1] sm:$0xff]  ;;  %v19_v1 = vld [vmem:[%s525_s1 + $0x8] sm:$0xff]  ;;  %362 = vset.pattern.permute.xlu1 %v408_v2  ;;  %361 = vset.pattern.permute.xlu0 %v409_v3  ;;  %v377_v9 = vld [vmem:[%s526_s2 + $0x38] sm:$0xff]   ;;  %v411_v22 = vmov 1  }
   0x2   :  { %v30_v4 = vadd.s32 36, %v18_v0  ;;  %v20_v5 = vadd.s32 12, %v18_v0  ;;  %v31_v6 = vadd.s32 36, %v19_v1  ;;  %v21_v7 = vadd.s32 12, %v19_v1  ;;  %v78_v8 = vld [vmem:[%s524_s0] sm:$0xff]  ;;  %v79_v10 = vld [vmem:[%s524_s0 + $0x8] sm:$0xff]  ;;  %331 = vmatprep.subr.bf16.mxu0 %v410_v12 }
   0x3   :  { %v83_v13 = vshrl.u32 %v16_v11, 7  ;;  %332 = vmatpush3.bf16.msra.mxu0 %v377_v9  ;;  %v43_v14 = vadd.s32 43, %v19_v1  ;;  %v378_v15 = vld [vmem:[%s526_s2 + $0x30] sm:$0xff]   ;;  %v42_v16 = vadd.s32 43, %v18_v0  ;;  %v88_v17 = vrot.slane %v79_v10, 1  ;;  %v379_v23 = vld [vmem:[%s526_s2 + $0x28] sm:$0xff]  }
   0x4   :  { %33 = vperm.xlu1 %362, %v30_v4   ;;  %23 = vperm.xlu0 %361, %v20_v5   ;;  %v87_v18 = vrot.slane %v78_v8, 1 }
   0x5   :  { %v92_v19 = vadd.s32 8, %v83_v13  ;;  %333 = vmatprep.subr.bf16.mxu0 %v410_v12  ;;  %v97_v20 = vand.u32 7, %v83_v13  ;;  %vm89_vm0 = vcmp.lt.s32.totalorder %v83_v13, 7 }
   0x7   :  { %v104_v21 = vand.u32 7, %v92_v19  ;;  %334 = vmatpush3.bf16.msra.mxu0 %v378_v15 }
   0x8   :  { %36 = vperm.xlu1 %362, %v31_v6   ;;  %26 = vperm.xlu0 %361, %v21_v7  }
   0xc   :  { %364 = vset.pattern.permute.xlu1 %v411_v22  ;;  %363 = vset.pattern.permute.xlu0 %v411_v22 }
   0xd   :  { %8 = vsyncpa [#allocation4], 0  ;;  %48 = vperm.xlu1 %364, %v43_v14   ;;  %45 = vperm.xlu0 %363, %v42_v16   ;;  %v54_v24 = vadd.s32 75, %v18_v0  ;;  %v55_v25 = vadd.s32 75, %v19_v1  ;;  %v81_v26 = vrot.slane %v79_v10, 7  ;;  %v80_v27 = vrot.slane %v78_v8, 7 }
   0xe   :  { %335 = vmatprep.subr.bf16.mxu0 %v410_v12  ;;  %v90_v28 = vsel %vm89_vm0, %v87_v18, %v88_v17  ;;  %v91_v29 = vsel %vm89_vm0, %v88_v17, %v87_v18  ;;  %vm463_vm1 = vcmp.eq.s32.totalorder %v97_v20, 7  ;;  %vm467_vm2 = vcmp.eq.s32.totalorder %v104_v21, 7  ;;  %v380_v32 = vld [vmem:[%s526_s2 + $0x20] sm:$0xff]   ;;  %v381_v43 = vld [vmem:[%s526_s2 + $0x18] sm:$0xff]   ;;  %s413_s28 = smov 4   ;;  %v382_v45 = vld [vmem:[%s526_s2 + $0x10] sm:$0xff]  }
   0xf   :  { %336 = vmatpush3.bf16.msra.mxu0 %v379_v23  ;;  %v412_v33 = vmov 0   ;;  %v367_v34 = vpack.i.bf16 %v79_v10, %v78_v8  ;;  %v123_v35 = vsel %vm463_vm1, %v91_v29, %v90_v28  ;;  %v124_v36 = vsel %vm467_vm2, %v90_v28, %v91_v29  ;;  %s414_s4 = smov 8   ;;  %v383_v46 = vld [vmem:[%s526_s2 + $0x8] sm:$0xff]   ;;  %v384_v47 = vld [vmem:[%s526_s2] sm:$0xff]   ;;  %s416_s2 = smov [#allocation3]  }
  0x10   :  { %337 = vmatprep.subr.bf16.mxu0 %v410_v12  ;;  %vm84_vm3 = vcmp.lt.s32.totalorder %v83_v13, 1  ;;  %vm483_vm4 = vcmp.eq.s32.totalorder %v97_v20, 0  ;;  %vm487_vm5 = vcmp.eq.s32.totalorder %v104_v21, 0  ;;  %v372_v44 = vpack.i.bf16 %v124_v36, %v123_v35  ;;  %s287_s9 = sshll.u32 %s416_s2, 4  ;;  %s288_s9 = int_to_ptr.vmem [resolvable:$true] %s287_s9 }
  0x11   :  { %365 = vset.pattern.permute.xlu1 %v412_v33  ;;  %366 = vset.pattern.permute.xlu0 %v412_v33  ;;  %v479_v37 = vsel %vm84_vm3, %v80_v27, %v81_v26  ;;  %v481_v38 = vsel %vm84_vm3, %v81_v26, %v80_v27  ;;  %vm415_vm6 = vmmov 0   ;;  %v17_v52 = vand.u32 127, %v16_v11  ;;  %s386_s10 = scalar_lea.vmem %s288_s9, 128  ;;  %p391_p1 = scmp.lt.s32.totalorder %s288_s9, %s288_s9 }
  0x12   :  { %57 = vperm.xlu1 %365, %v54_v24   ;;  %60 = vperm.xlu0 %366, %v55_v25   ;;  %v119_v41 = vsel %vm483_vm4, %v479_v37, %v481_v38  ;;  %v120_v42 = vsel %vm487_vm5, %v481_v38, %v479_v37  ;;  %vm141_vm5 = vcmask 31744   ;;  %p387_p0 = scmp.ne.s32.totalorder %s288_s9, %s386_s10  ;;  %p392_p2 = scmp.lt.s32.totalorder %s386_s10, %s386_s10 }
  0x13   :  { %338 = vmatpush3.bf16.msra.mxu0 %v380_v32  ;;  %347 = vmatprep.mubr.msk.bf16.mxu0 %vm415_vm6, %v410_v12  ;;  %vm144_vm6 = vcmask 64512  }
  0x14   :  { %339 = vmatprep.subr.bf16.mxu0 %v410_v12  ;;  %p393_p3 = por %p392_p2, %p391_p1 }
  0x16   :  { %368 = vrot.lane.b32.xlu1 %v367_v34, %s413_s28  ;;  %p394_p4 = pnand %p393_p3, %p387_p0 }
  0x17   :  { %340 = vmatpush3.bf16.msra.mxu0 %v381_v43 }
  0x18   :  { %341 = vmatprep.subr.bf16.mxu0 %v410_v12 }
  0x1a   :  { %373 = vrot.lane.b32.xlu1 %v372_v44, %s414_s4 }
  0x1b   :  { %342 = vmatpush3.bf16.msra.mxu0 %v382_v45 }
  0x1c   :  { %343 = vmatprep.subr.bf16.mxu0 %v410_v12 }
  0x1f   :  { %344 = vmatpush3.bf16.msra.mxu0 %v383_v46 }
  0x20   :  { %345 = vmatprep.subr.bf16.mxu0 %v410_v12 }
  0x23   :  { %346 = vmatpush3.bf16.msra.mxu0 %v384_v47 }
  0x7f   :  { %v34_v48 = vpop.permute.xlu1 %33  ;;  %v24_v49 = vpop.permute.xlu0 %23 }
  0x80   :  { %vm38_vm7 = vcmp.eq.s32.totalorder %v17_v52, %v34_v48  ;;  %vm28_vm8 = vcmp.eq.s32.totalorder %v17_v52, %v24_v49 }
  0x81   :  { %vm40_vm12 = vmor %vm28_vm8, %vm38_vm7  ;;  %vm155_vm7 = vcmask 93184   ;;  %vm279_vm8 = vcmask 257024  }
  0x83   :  { %v37_v50 = vpop.permute.xlu1 %36  ;;  %v27_v51 = vpop.permute.xlu0 %26 }
  0x84   :  { %vm39_vm9 = vcmp.eq.s32.totalorder %v17_v52, %v37_v50  ;;  %vm29_vm10 = vcmp.eq.s32.totalorder %v17_v52, %v27_v51 }
  0x85   :  { %vm41_vm14 = vmor %vm29_vm10, %vm39_vm9 }
  0x88   :  { %v49_v53 = vpop.permute.xlu1 %48  ;;  %v46_v54 = vpop.permute.xlu0 %45 }
  0x89   :  { %vm51_vm11 = vcmp.eq.s32.totalorder %v17_v52, %v49_v53  ;;  %vm50_vm13 = vcmp.eq.s32.totalorder %v17_v52, %v46_v54 }
  0x8a   :  { %vm53_vm15 = vmor %vm41_vm14, %vm51_vm11 }
  0x8b   :  { %vm52_vm0 = vmor %vm40_vm12, %vm50_vm13 }
  0x8d   :  { %v58_v55 = vpop.permute.xlu1 %57  ;;  %v61_v56 = vpop.permute.xlu0 %60 }
  0x8e   :  { %vm62_vm1 = vcmp.eq.s32.totalorder %v17_v52, %v58_v55  ;;  %vm63_vm2 = vcmp.eq.s32.totalorder %v17_v52, %v61_v56 }
  0x8f   :  { %vm64_vm3 = vmor %vm52_vm0, %vm62_vm1 }
  0x90   :  { %v66_v57 = vsel %vm64_vm3, 1.0, %v410_v12  ;;  %vm65_vm4 = vmor %vm53_vm15, %vm63_vm2 }
  0x91   :  { %v67_v58 = vsel %vm65_vm4, 1.0, %v410_v12  ;;  %v369_v59 = vpop.permute.xlu1 %368 }
  0x92   :  { %v320_v60 = vpack.c.bf16 %v67_v58, %v66_v57  ;;  %v371_v61 = vunpack.i.h.bf16 %v369_v59  ;;  %v370_v62 = vunpack.i.l.bf16 %v369_v59 }
  0x94   :  { %321 = vst [vmem:[#allocation2] sm:$0xff] %v320_v60   ;;  %v142_v2 = vsel %vm141_vm5, %v119_v41, %v370_v62  ;;  %v143_v3 = vsel %vm141_vm5, %v120_v42, %v371_v61 }
  0x95   :  { %v374_v63 = vpop.permute.xlu1 %373 }
  0x96   :  { %v376_v0 = vunpack.i.h.bf16 %v374_v63  ;;  %v375_v1 = vunpack.i.l.bf16 %v374_v63 }
  0x98   :  { %v145_v4 = vsel %vm144_vm6, %v142_v2, %v375_v1  ;;  %v146_v5 = vsel %vm144_vm6, %v143_v3, %v376_v0 }
  0x99   :  { %v315_v6 = vpack.c.bf16 %v145_v4, %v145_v4  ;;  %v316_v7 = vpack.c.bf16 %v146_v5, %v146_v5 }
  0x9b   :  { %156 = vst.msk [vmem:[#allocation2] sm:$0xf] %vm155_vm7, %v315_v6  ;;  %157 = vst.msk [vmem:[#allocation2 + $0x4] sm:$0xf] %vm155_vm7, %v316_v7 }
  0xa2   :  { %v385_v8 = vld [vmem:[#allocation2] sm:$0xff]  }
  0xa3   :  { %348 = vmatmul.mubr.bf16.vlgmr.msra.gmra.mxu0 %v385_v8 }
 0x163   :  { %v264_v9 = vpop.f32.mrf.mxu0 }
 0x164   :  { %v317_v10 = vpack.c.bf16 %v264_v9, %v264_v9 }
 0x165   :  { %v349_v11 = vpop.f32.mrf.mxu0 }
 0x166   :  { %280 = vst.msk [vmem:[#allocation3] sm:$0xf] %vm279_vm8, %v317_v10 }
 0x167   :  { %v267_v12 = vpop.f32.mrf.mxu0 }
 0x168   :  { %v318_v13 = vpack.c.bf16 %v267_v12, %v267_v12 }
 0x169   :  { %v350_v14 = vpop.f32.mrf.mxu0 }
 0x16a   :  { %281 = vst.msk [vmem:[#allocation3 + $0x4] sm:$0xf] %vm279_vm8, %v318_v13 }
 0x16b   :  { %397 = shalt.err (!%p394_p4)
}
 0x16c   :  { %s417_s11 = smov 64  }
 0x16d   :  { %293 = dma.vmem_to_hbm [thread:$0]  %s288_s9, 128, %s527_s3, [#allocation4], %s417_s11, %s417_s11, %s413_s28  }
 0x16e   :  { %406 = dma.done.wait [#allocation4], 128  }
 0x16f   :  { %407 = vsyncadd [#allocation4], 4294967168 }
 0x170   :  { %297 = vsyncpa [#allocation4], 1 }

</bundles_post_ra>
